<compile_context>
chip_gen: v5e
topology: v5e:2x2
jax: 0.10.0
libtpu: 0.0.40
codegen_flags: <defaults>
</compile_context>

<pallas_src>
import functools
import math

import jax
import jax.numpy as jnp
from jax.experimental import pallas as pl
from jax.experimental.pallas import tpu as pltpu


_LANES = 128
_MAX_PACKED_COLS = 1024      # cap on the lane-dense packed row width
_CHUNK_TARGET_ELEMS = 8192   # ~8 vregs per (chunk, cols) f32 temporary
_MAX_CHUNKS_PER_TILE = 16    # bound on the fully-unrolled inner loop


def _cdiv(a, b):
    return -(-a // b)


def _round_up(a, b):
    return _cdiv(a, b) * b


def _rope_cache_kernel(pack, chunk, tbl_ref, cos_ref, sin_ref):
    """Write one (tile_rows, cols) block of the packed cos/sin cache.

    tbl_ref: (2, cols) f32.  Row 0 = cat([inv_freq, inv_freq]) tiled over the
    `pack` packed positions; row 1 = per-pack position offsets (0..pack-1,
    each repeated d_emb times).  Output element (r, j*d_emb + k) holds
    cos/sin(pos * inv_emb[k]) with pos = (block_row0 + r) * pack + j.
    """
    tile_rows, cols = cos_ref.shape
    n_chunks = tile_rows // chunk           # exact by construction

    inv = tbl_ref[0:1, :]                   # (1, cols)
    off = tbl_ref[1:2, :]                   # (1, cols)
    # angle = (row*pack + off) * inv == row*(pack*inv) + off*inv  -> hoist both.
    inv_s = inv * jnp.float32(pack)         # (1, cols), loop-invariant
    off_i = off * inv                       # (1, cols), loop-invariant
    # Hoisted relative-row iota + f32 cast; exact in f32 for positions < 2^24.
    rel = jax.lax.broadcasted_iota(jnp.int32, (chunk, cols), 0).astype(jnp.float32)
    base = rel * inv_s + off_i              # (chunk, cols), loop-invariant

    block_row0 = pl.program_id(0) * tile_rows

    # Fully-unrolled static loop (n_chunks <= 16).  Per chunk: one broadcast
    # add per element + cos + sin + two lane-dense stores.
    for c in range(n_chunks):
        r0 = c * chunk
        start_f = (block_row0 + r0).astype(jnp.float32)
        angle = base + start_f * inv_s
        cos_ref[pl.ds(r0, chunk), :] = jnp.cos(angle).astype(cos_ref.dtype)
        sin_ref[pl.ds(r0, chunk), :] = jnp.sin(angle).astype(sin_ref.dtype)


@functools.partial(jax.jit, static_argnames=("seq_len", "out_dtype"))
def _build_cos_sin_cache(inv_freq, *, seq_len, out_dtype):
    """inv_freq: (dim//2,) float32 -> (cos, sin) each (seq_len, dim) in out_dtype."""
    inv_freq = inv_freq.astype(jnp.float32)
    d_emb = 2 * inv_freq.shape[0]           # width of emb = cat([freqs, freqs])

    # Lane-dense packing: store `pack` consecutive sequence positions per row
    # so the stored last dim is a multiple of 128 (unmasked vector stores).
    g = math.gcd(d_emb, _LANES)
    lcm = d_emb * _LANES // g
    if lcm <= _MAX_PACKED_COLS:
        pack = lcm // d_emb
    else:
        pack = 1                             # very wide odd widths: masked stores
    cols = pack * d_emb

    # Inner chunk: ~8 vregs per (chunk, cols) f32 temporary, multiple of 16.
    chunk = max(16, min(256, ((_CHUNK_TARGET_ELEMS // cols) // 16) * 16))

    rows_needed = _cdiv(seq_len, pack)
    if rows_needed <= chunk:
        tile_rows = max(16, _round_up(rows_needed, 16))
        chunk = tile_rows
        grid_steps = 1
    else:
        max_tile_rows = _MAX_CHUNKS_PER_TILE * chunk
        grid_steps = max(2, _cdiv(rows_needed, max_tile_rows))
        grid_steps += grid_steps % 2         # even -> balanced 2-TC split (v7x)
        tile_rows = _round_up(_cdiv(rows_needed, grid_steps), chunk)
    # Pad so every grid block is full-size: no ragged edge block, positions
    # can never shift; the wrapper slices back to seq_len.
    rows = grid_steps * tile_rows

    inv_row = jnp.tile(jnp.concatenate([inv_freq, inv_freq]), pack)      # (cols,)
    off_row = jnp.repeat(jnp.arange(pack, dtype=jnp.float32), d_emb)     # (cols,)
    tbl = jnp.stack([inv_row, off_row], axis=0)                          # (2, cols)

    kernel = functools.partial(_rope_cache_kernel, pack, chunk)
    cos, sin = pl.pallas_call(
        kernel,
        out_shape=(jax.ShapeDtypeStruct((rows, cols), out_dtype),
                   jax.ShapeDtypeStruct((rows, cols), out_dtype)),
        grid_spec=pltpu.PrefetchScalarGridSpec(
            num_scalar_prefetch=0,
            grid=(grid_steps,),
            in_specs=[pl.BlockSpec((2, cols), lambda i: (0, 0))],
            out_specs=[pl.BlockSpec((tile_rows, cols), lambda i: (i, 0)),
                       pl.BlockSpec((tile_rows, cols), lambda i: (i, 0))],
        ),
        compiler_params=pltpu.CompilerParams(
            dimension_semantics=("parallel",),
        ),
    )(tbl)

    # Row-major unpack back to (seq_len, d_emb); the reshape is free and the
    # slice drops only the padded tail rows.
    cos = cos.reshape(rows * pack, d_emb)[:seq_len]
    sin = sin.reshape(rows * pack, d_emb)[:seq_len]
    return cos, sin


class MixtralRotaryEmbeddingPallas:
    """JAX/Pallas port of MixtralRotaryEmbedding with per-dtype cache."""

    def __init__(self, dim, max_position_embeddings=2048, base=10000):
        self.dim = dim
        self.max_position_embeddings = max_position_embeddings
        self.base = base
        # deterministic buffer, exactly as in the torch __init__
        self.inv_freq = 1.0 / (
            self.base ** (jnp.arange(0, self.dim, 2, dtype=jnp.float32) / self.dim)
        )
        # torch builds the initial cache in the default dtype (float32)
        self._set_cos_sin_cache(seq_len=max_position_embeddings, dtype=jnp.float32)

    def _set_cos_sin_cache(self, seq_len, dtype):
        self.max_seq_len_cached = seq_len
        self._caches = {}                    # dtype -> (cos, sin) at cached length
        self._ensure_cache(dtype)

    def _ensure_cache(self, dtype):
        dt = jnp.dtype(dtype)
        if dt not in self._caches:
            self._caches[dt] = _build_cos_sin_cache(
                self.inv_freq, seq_len=self.max_seq_len_cached, out_dtype=dt
            )
        # keep torch-like buffer attributes pointing at the most recent dtype
        self.cos_cached, self.sin_cached = self._caches[dt]
        return self._caches[dt]

    def __call__(self, x, seq_len=None):
        if seq_len > self.max_seq_len_cached:
            self._set_cos_sin_cache(seq_len=seq_len, dtype=x.dtype)
        cos, sin = self._ensure_cache(x.dtype)   # already in x.dtype: no per-call astype
        return cos[:seq_len], sin[:seq_len]


if __name__ == "__main__":
    # Small shapes consistent with the module's usage:
    # x: (batch, seq, head_dim) -- only its dtype matters to forward.
    batch, seq, dim = 2, 8, 32
    max_pos = 64

    key = jax.random.PRNGKey(0)
    x = jax.random.normal(key, (batch, seq, dim), dtype=jnp.float32)

    rope = MixtralRotaryEmbeddingPallas(dim=dim, max_position_embeddings=max_pos)
    cos, sin = rope(x, seq_len=seq)
    cos, sin = jax.block_until_ready((cos, sin))

    # Reference (same math as the torch module), long enough for the growth test.
    t = jnp.arange(128, dtype=jnp.float32)
    freqs = jnp.outer(t, rope.inv_freq)
    emb = jnp.concatenate([freqs, freqs], axis=-1)
    ref_cos = jnp.cos(emb)
    ref_sin = jnp.sin(emb)

    assert cos.shape == (seq, dim) and sin.shape == (seq, dim)
    assert cos.dtype == x.dtype and sin.dtype == x.dtype
    assert jnp.allclose(cos, ref_cos[:seq], atol=1e-5)
    assert jnp.allclose(sin, ref_sin[:seq], atol=1e-5)

    # Full initial cache exercises the lane-dense row packing across many rows.
    cos_full, sin_full = rope._ensure_cache(jnp.float32)
    assert jnp.allclose(cos_full, ref_cos[:max_pos], atol=1e-5)
    assert jnp.allclose(sin_full, ref_sin[:max_pos], atol=1e-5)

    # Growth path: seq_len > cached triggers a rebuild in x.dtype.
    cos_g, sin_g = rope(x, seq_len=96)
    cos_g, sin_g = jax.block_until_ready((cos_g, sin_g))
    assert cos_g.shape == (96, dim) and rope.max_seq_len_cached == 96
    assert jnp.allclose(cos_g, ref_cos[:96], atol=1e-5)
    assert jnp.allclose(sin_g, ref_sin[:96], atol=1e-5)

    # bf16 path: cache is built/stored directly in bf16 (no per-call astype).
    x_bf16 = x.astype(jnp.bfloat16)
    cos_b, sin_b = rope(x_bf16, seq_len=seq)
    cos_b, sin_b = jax.block_until_ready((cos_b, sin_b))
    assert cos_b.dtype == jnp.bfloat16 and sin_b.dtype == jnp.bfloat16
    assert jnp.allclose(cos_b.astype(jnp.float32), ref_cos[:seq], atol=1e-2)
    assert jnp.allclose(sin_b.astype(jnp.float32), ref_sin[:seq], atol=1e-2)

    print("KERNEL_OK")
</pallas_src>

<mosaic_0001>
module attributes {stable_mosaic.version = 11 : i64} {
  func.func @_rope_cache_kernel(%arg0: i32, %arg1: memref<2x128xf32, #tpu.memory_space<vmem>>, %arg2: memref<16x128xf32, #tpu.memory_space<vmem>>, %arg3: memref<16x128xf32, #tpu.memory_space<vmem>>) attributes {dimension_semantics = [#tpu.dimension_semantics<parallel>], iteration_bounds = array<i64: 1>, scalar_prefetch = 0 : i64, scratch_operands = 0 : i64, tpu.core_type = #tpu.core_type<tc>, window_params = [{pipeline_mode = #tpu.pipeline_mode<synchronous>, transform_indices = @transform_0, window_bounds = array<i64: 2, 128>}, {transform_indices = @transform_1, window_bounds = array<i64: 16, 128>}, {transform_indices = @transform_2, window_bounds = array<i64: 16, 128>}]} {
    %c0 = arith.constant 0 : index
    %c0_0 = arith.constant 0 : index
    %0 = vector.load %arg1[%c0, %c0_0] : memref<2x128xf32, #tpu.memory_space<vmem>>, vector<1x128xf32>
    %c1 = arith.constant 1 : index
    %c0_1 = arith.constant 0 : index
    %1 = vector.load %arg1[%c1, %c0_1] : memref<2x128xf32, #tpu.memory_space<vmem>>, vector<1x128xf32>
    %cst = arith.constant 4.000000e+00 : f32
    %2 = vector.broadcast %cst : f32 to vector<1x128xf32>
    %3 = arith.mulf %0, %2 : vector<1x128xf32>
    %4 = arith.mulf %1, %0 : vector<1x128xf32>
    %5 = tpu.iota {dimensions = array<i32: 0>} : vector<16x128xi32>
    %6 = arith.sitofp %5 : vector<16x128xi32> to vector<16x128xf32>
    %7 = vector.broadcast %3 : vector<1x128xf32> to vector<16x128xf32>
    %8 = arith.mulf %6, %7 : vector<16x128xf32>
    %9 = vector.broadcast %4 : vector<1x128xf32> to vector<16x128xf32>
    %10 = arith.addf %8, %9 : vector<16x128xf32>
    %c16_i32 = arith.constant 16 : i32
    %11 = arith.muli %arg0, %c16_i32 : i32
    %c0_i32 = arith.constant 0 : i32
    %12 = arith.addi %11, %c0_i32 : i32
    %13 = arith.sitofp %12 : i32 to f32
    %14 = vector.broadcast %13 : f32 to vector<1x128xf32>
    %15 = arith.mulf %14, %3 : vector<1x128xf32>
    %16 = vector.broadcast %15 : vector<1x128xf32> to vector<16x128xf32>
    %17 = arith.addf %10, %16 : vector<16x128xf32>
    %18 = math.cos %17 : vector<16x128xf32>
    %c0_2 = arith.constant 0 : index
    %c0_3 = arith.constant 0 : index
    %19 = vector.load %arg2[%c0_2, %c0_3] : memref<16x128xf32, #tpu.memory_space<vmem>>, vector<16x128xf32>
    tpu.vector_store %arg2[%c0_2, %c0_3], %18 {strides = array<i32>} : memref<16x128xf32, #tpu.memory_space<vmem>>, vector<16x128xf32>,
    %20 = math.sin %17 : vector<16x128xf32>
    %c0_4 = arith.constant 0 : index
    %c0_5 = arith.constant 0 : index
    %21 = vector.load %arg3[%c0_4, %c0_5] : memref<16x128xf32, #tpu.memory_space<vmem>>, vector<16x128xf32>
    tpu.vector_store %arg3[%c0_4, %c0_5], %20 {strides = array<i32>} : memref<16x128xf32, #tpu.memory_space<vmem>>, vector<16x128xf32>,
    return
  }
  func.func @transform_0(%arg0: i32) -> (i32, i32) {
    %c0_i32 = arith.constant 0 : i32
    %c0_i32_0 = arith.constant 0 : i32
    %c0_i32_1 = arith.constant 0 : i32
    return %c0_i32, %c0_i32_0 : i32, i32
  }
  func.func @transform_1(%arg0: i32) -> (i32, i32) {
    %c0_i32 = arith.constant 0 : i32
    %c0_i32_0 = arith.constant 0 : i32
    return %arg0, %c0_i32 : i32, i32
  }
  func.func @transform_2(%arg0: i32) -> (i32, i32) {
    %c0_i32 = arith.constant 0 : i32
    %c0_i32_0 = arith.constant 0 : i32
    return %arg0, %c0_i32 : i32, i32
  }
}

</mosaic_0001>

<bundles_post_ra>
// kernel: tile.8
= control target key start
LH: loop header
LB: loop body
LE: loop exit
PB: predicated region body
PF: predicated region fallthrough
CT: control target
= control target key end

     0   :  { %s22_s0 = inlined_call_operand.vmem [shape: f32[32], index: 0, kind: input, shape index: {}]   ;;  %s23_s1 = inlined_call_operand.vmem [shape: f32[4,32], index: 1, kind: output, shape index: {}]  }
   0x1   :  { %v4_v0 = vld [vmem:[%s22_s0] ss:$0 sm:$0xff] }
   0x2   :  { %5 = vst [vmem:[%s23_s1] sm:$0xf] %v4_v0 }

// kernel: tile.9
= control target key start
LH: loop header
LB: loop body
LE: loop exit
PB: predicated region body
PF: predicated region fallthrough
CT: control target
= control target key end

     0   :  { %s37_s8 = smov 32   ;;  %s38_s9 = smov 64   ;;  %vm7_vm0 = vcmask 261120   ;;  %vm13_vm1 = vcmask 1048320   ;;  %vm19_vm2 = vcmask 785920   ;;  %vm25_vm3 = vcmask 523520   ;;  %s55_s0 = inlined_call_operand.vmem [shape: f32[4,32], index: 0, kind: input, shape index: {}]   ;;  %s56_s1 = inlined_call_operand.vmem [shape: f32[1,128], index: 1, kind: output, shape index: {}]  }
   0x1   :  { %v4_v0 = vld [vmem:[%s55_s0] sm:$0xf]  ;;  %s36_s0 = smov 96  }
   0x2   :  { %5 = vst [vmem:[#allocation1] sm:$0xf] %v4_v0 }
   0x9   :  { %v10_v1 = vld [vmem:[#allocation1 + $0x3] sm:$0x1]   ;;  %v22_v2 = vld [vmem:[#allocation1 + $0x1] sm:$0x1]   ;;  %v16_v3 = vld [vmem:[#allocation1 + $0x2] sm:$0x1]  }
   0xa   :  { %11 = vrot.lane.b32.xlu0 %v10_v1, %s36_s0  ;;  %23 = vrot.lane.b32.xlu1 %v22_v2, %s37_s8  ;;  %v6_v4 = vld [vmem:[#allocation1] sm:$0x1]  }
   0xb   :  { %8 = vst.msk [vmem:[#allocation0] sm:$0x1] %vm7_vm0, %v6_v4  }
  0x12   :  { %17 = vrot.lane.b32.xlu0 %v16_v3, %s38_s9 }
  0x7c   :  { %v12_v5 = vpop.permute.xlu0 %11   ;;  %v24_v6 = vpop.permute.xlu1 %23  }
  0x7d   :  { %14 = vst.msk [vmem:[#allocation0] sm:$0x1] %vm13_vm1, %v12_v5  }
  0x84   :  { %v18_v7 = vpop.permute.xlu0 %17  }
  0x85   :  { %20 = vst.msk [vmem:[#allocation0] sm:$0x1] %vm19_vm2, %v18_v7  }
  0x86   :  { %26 = vst.msk [vmem:[#allocation0] sm:$0x1] %vm25_vm3, %v24_v6  }
  0x8d   :  { %v29_v8 = vld [vmem:[#allocation0] sm:$0x1] }
  0x8e   :  { %32 = vst [vmem:[%s56_s1] sm:$0x1] %v29_v8 }

// kernel: _build_cos_sin_cache.1
= control target key start
LH: loop header
LB: loop body
LE: loop exit
PB: predicated region body
PF: predicated region fallthrough
CT: control target
= control target key end

     0   :  { %v14_v0 = vlaneseq  ;;  %v681_v38 = vmov 683565275   ;;  %v682_v40 = vmov 2475754826   ;;  %v683_v42 = vmov 2131351028   ;;  %s867_s0 = inlined_call_operand.vmem [shape: f32[2,128], index: 0, kind: input, shape index: {}]   ;;  %s868_s1 = inlined_call_operand.vmem [shape: f32[16,128], index: 1, kind: output, shape index: {0}]   ;;  %s869_s2 = inlined_call_operand.vmem [shape: f32[16,128], index: 2, kind: output, shape index: {1}]  }
   0x1   :  { %v10_v1 = vld [vmem:[%s867_s0] sm:$0x1]  ;;  %v11_v2 = vld [vmem:[%s867_s0 + $0x1] sm:$0x1]  ;;  %v684_v44 = vmov 2102212464  }
   0x2   :  { %v12_v3 = vmul.f32 4.0, %v10_v1  ;;  %v13_v4 = vmul.f32 %v11_v2, %v10_v1  ;;  %v15_v5 = vshrl.u32 %v14_v0, 7  ;;  %v685_v46 = vmov 920167782  }
   0x3   :  { %v686_v55 = vmov 1326507024  }
   0x4   :  { %v16_v6 = vadd.s32 8, %v15_v5  ;;  %v17_v7 = vcvt.s32.f32 %v15_v5  ;;  %v19_v8 = vperm.slane %v12_v3, 0  ;;  %v22_v9 = vperm.slane %v13_v4, 0 }
   0x5   :  { %v28_v10 = vmul.f32 0.0, %v12_v3 }
   0x6   :  { %v18_v11 = vcvt.s32.f32 %v16_v6  ;;  %v20_v12 = vmul.f32 %v19_v8, %v17_v7 }
   0x7   :  { %v29_v13 = vperm.slane %v28_v10, 0 }
   0x8   :  { %v21_v14 = vmul.f32 %v19_v8, %v18_v11  ;;  %v23_v15 = vadd.f32 %v22_v9, %v20_v12 }
   0xa   :  { %v24_v16 = vadd.f32 %v22_v9, %v21_v14  ;;  %v709_v17 = vadd.f32 %v29_v13, %v23_v15 }
   0xc   :  { %v711_v18 = vadd.f32 %v29_v13, %v24_v16  ;;  %v32_v19 = vand.u32 2147483647, %v709_v17  ;;  %v35_v20 = vand.u32 2139095040, %v709_v17 }
   0xe   :  { %v36_v21 = vshrl.u32 %v35_v20, 23  ;;  %v39_v22 = vand.u32 8388607, %v32_v19  ;;  %v189_v23 = vand.u32 2139095040, %v711_v18  ;;  %v186_v24 = vand.u32 2147483647, %v711_v18 }
  0x10   :  { %v662_v25 = vadd.s32 4294967169, %v36_v21  ;;  %v190_v26 = vshrl.u32 %v189_v23, 23  ;;  %v40_v27 = vor.u32 8388608, %v39_v22  ;;  %v193_v30 = vand.u32 8388607, %v186_v24 }
  0x12   :  { %v42_v28 = vadd.s32 1, %v662_v25  ;;  %v665_v29 = vadd.s32 4294967169, %v190_v26  ;;  %v721_v33 = vshll.u32 %v40_v27, 8  ;;  %v194_v36 = vor.u32 8388608, %v193_v30 }
  0x14   :  { %vm43_vm0 = vcmp.gt.s32.totalorder %v42_v28, 0  ;;  %v196_v31 = vadd.s32 1, %v665_v29  ;;  %v81_v48 = vand.u32 65535, %v721_v33  ;;  %v82_v9 = vshrl.u32 %v721_v33, 16 }
  0x15   :  { %v44_v32 = vsel %vm43_vm0, %v42_v28, 0  ;;  %v737_v10 = vshll.u32 %v194_v36, 8 }
  0x16   :  { %v46_v34 = vand.u32 31, %v44_v32  ;;  %vm197_vm1 = vcmp.gt.s32.totalorder %v196_v31, 0  ;;  %v45_v35 = vshrl.u32 %v44_v32, 5 }
  0x17   :  { %v198_v49 = vsel %vm197_vm1, %v196_v31, 0 }
  0x18   :  { %v47_v37 = vsub.s32 32, %v46_v34  ;;  %v49_v39 = vshll.u32 %v681_v38, %v46_v34  ;;  %v52_v41 = vshll.u32 %v682_v40, %v46_v34  ;;  %v55_v43 = vshll.u32 %v683_v42, %v46_v34 }
  0x19   :  { %v58_v45 = vshll.u32 %v684_v44, %v46_v34  ;;  %v61_v47 = vshll.u32 %v685_v46, %v46_v34  ;;  %vm64_vm2 = vcmp.lt.s32.totalorder %v45_v35, 1  ;;  %vm65_vm3 = vcmp.lt.s32.totalorder %v45_v35, 2 }
  0x1a   :  { %v48_v50 = vshrl.u32 %v681_v38, %v47_v37  ;;  %v50_v51 = vshrl.u32 %v682_v40, %v47_v37  ;;  %v53_v52 = vshrl.u32 %v683_v42, %v47_v37  ;;  %v56_v53 = vshrl.u32 %v684_v44, %v47_v37 }
  0x1b   :  { %v59_v54 = vshrl.u32 %v685_v46, %v47_v37  ;;  %v62_v56 = vshrl.u32 %v686_v55, %v47_v37  ;;  %vm67_vm4 = vcmp.lt.s32.totalorder %v45_v35, 4  ;;  %vm66_vm5 = vcmp.lt.s32.totalorder %v45_v35, 3 }
  0x1c   :  { %v51_v57 = vor.u32 %v50_v51, %v49_v39  ;;  %v54_v58 = vor.u32 %v53_v52, %v52_v41  ;;  %v57_v59 = vor.u32 %v56_v53, %v55_v43  ;;  %v731_v62 = vand.u32 31, %v198_v49 }
  0x1d   :  { %v60_v60 = vor.u32 %v59_v54, %v58_v45  ;;  %v63_v61 = vor.u32 %v62_v56, %v61_v47  ;;  %v744_v14 = vshrl.u32 %v198_v49, 5  ;;  %v687_v52 = vmov 0  }
  0x1e   :  { %v68_v63 = vsel %vm64_vm2, %v48_v50, %v51_v57  ;;  %v69_v0 = vsel %vm67_vm4, %v57_v59, 2102212464  ;;  %v72_v1 = vsel %vm64_vm2, %v51_v57, %v54_v58  ;;  %v76_v2 = vsel %vm64_vm2, %v54_v58, %v57_v59 }
  0x1f   :  { %v70_v3 = vsel %vm66_vm5, %v54_v58, %v69_v0  ;;  %v73_v4 = vsel %vm67_vm4, %v60_v60, 920167782  ;;  %v77_v5 = vsel %vm67_vm4, %v63_v61, 1326507024  ;;  %v734_v6 = vsub.s32 32, %v731_v62 }
  0x20   :  { %v74_v7 = vsel %vm66_vm5, %v57_v59, %v73_v4  ;;  %v78_v8 = vsel %vm66_vm5, %v60_v60, %v77_v5  ;;  %v740_v11 = vsel %vm65_vm3, %v68_v63, %v70_v3  ;;  %v203_v22 = vshll.u32 %v681_v38, %v731_v62 }
  0x21   :  { %v75_v12 = vsel %vm65_vm3, %v72_v1, %v74_v7  ;;  %v79_v13 = vsel %vm65_vm3, %v76_v2, %v78_v8  ;;  %v204_v23 = vshrl.u32 %v682_v40, %v734_v6  ;;  %v206_v25 = vshll.u32 %v682_v40, %v731_v62 }
  0x22   :  { %v83_v15 = vand.u32 65535, %v79_v13  ;;  %v84_v16 = vshrl.u32 %v79_v13, 16  ;;  %v105_v20 = vand.u32 65535, %v75_v12  ;;  %v106_v21 = vshrl.u32 %v75_v12, 16 }
  0x23   :  { %v207_v26 = vshrl.u32 %v683_v42, %v734_v6  ;;  %v209_v30 = vshll.u32 %v683_v42, %v731_v62  ;;  %v752_v51 = vor.u32 %v204_v23, %v203_v22  ;;  %v212_v57 = vshll.u32 %v684_v44, %v731_v62 }
  0x24   :  { %v85_v27 = vmul.u32 %v83_v15, %v81_v48  ;;  %v86_v28 = vmul.u32 %v84_v16, %v81_v48  ;;  %v87_v29 = vmul.u32 %v83_v15, %v82_v9  ;;  %v88_v31 = vmul.u32 %v84_v16, %v82_v9 }
  0x25   :  { %v107_v32 = vmul.u32 %v105_v20, %v81_v48  ;;  %v108_v34 = vmul.u32 %v106_v21, %v81_v48  ;;  %v109_v35 = vmul.u32 %v105_v20, %v82_v9  ;;  %v110_v41 = vmul.u32 %v106_v21, %v82_v9 }
  0x26   :  { %v89_v36 = vshll.u32 %v86_v28, 16  ;;  %v90_v37 = vshrl.u32 %v86_v28, 16  ;;  %v91_v39 = vshll.u32 %v87_v29, 16  ;;  %v92_v43 = vshrl.u32 %v87_v29, 16 }
  0x27   :  { %v111_v45 = vshll.u32 %v108_v34, 16  ;;  %v112_v47 = vshrl.u32 %v108_v34, 16  ;;  %v113_v49 = vshll.u32 %v109_v35, 16  ;;  %v114_v50 = vshrl.u32 %v109_v35, 16 }
  0x28   :  { %vm93_vm6 = vc.u32 %v85_v27, %v89_v36  ;;  %v95_v40 = vadd.s32 %v89_v36, %v85_v27  ;;  %v210_v48 = vshrl.u32 %v684_v44, %v734_v6  ;;  %v761_v60 = vor.u32 %v207_v26, %v206_v25 }
  0x29   :  { %v94_v42 = vsel %vm93_vm6, 1, %v687_v52  ;;  %vm115_vm7 = vc.u32 %v107_v32, %v111_v45  ;;  %v117_v53 = vadd.s32 %v111_v45, %v107_v32  ;;  %v213_v1 = vshrl.u32 %v685_v46, %v734_v6 }
  0x2a   :  { %v96_v54 = vadd.s32 %v94_v42, %v88_v31  ;;  %vm97_vm8 = vc.u32 %v95_v40, %v91_v39  ;;  %v116_v56 = vsel %vm115_vm7, 1, %v687_v52  ;;  %v211_v0 = vor.u32 %v210_v48, %v209_v30 }
  0x2b   :  { %v98_v58 = vsel %vm97_vm8, 1, %v687_v52  ;;  %v118_v59 = vadd.s32 %v116_v56, %v110_v41  ;;  %vm119_vm9 = vc.u32 %v117_v53, %v113_v49  ;;  %v215_v3 = vshll.u32 %v685_v46, %v731_v62 }
  0x2c   :  { %v100_v61 = vadd.s32 %v98_v58, %v96_v54  ;;  %v120_v63 = vsel %vm119_vm9, 1, %v687_v52  ;;  %v216_v44 = vshrl.u32 %v686_v55, %v734_v6  ;;  %vm218_vm10 = vcmp.lt.s32.totalorder %v744_v14, 1 }
  0x2d   :  { %v122_v2 = vadd.s32 %v120_v63, %v118_v59  ;;  %v771_v5 = vadd.s32 %v117_v53, %v113_v49  ;;  %v214_v7 = vor.u32 %v213_v1, %v212_v57  ;;  %vm220_vm11 = vcmp.lt.s32.totalorder %v744_v14, 3 }
  0x2e   :  { %v101_v4 = vadd.s32 %v100_v61, %v90_v37  ;;  %v217_v9 = vor.u32 %v216_v44, %v215_v3  ;;  %vm219_vm12 = vcmp.lt.s32.totalorder %v744_v14, 2  ;;  %vm221_vm13 = vcmp.lt.s32.totalorder %v744_v14, 4 }
  0x2f   :  { %v123_v8 = vadd.s32 %v122_v2, %v112_v47  ;;  %v226_v46 = vsel %vm218_vm10, %v752_v51, %v761_v60  ;;  %v227_v55 = vsel %vm221_vm13, %v214_v7, 920167782  ;;  %v235_v15 = vand.u32 65535, %v737_v10 }
  0x30   :  { %v776_v12 = vadd.s32 %v101_v4, %v92_v43  ;;  %v228_v13 = vsel %vm220_vm11, %v211_v0, %v227_v55  ;;  %v236_v16 = vshrl.u32 %v737_v10, 16  ;;  %v125_v20 = vmul.u32 %v721_v33, %v740_v11 }
  0x31   :  { %v124_v62 = vadd.s32 %v123_v8, %v114_v50  ;;  %v229_v21 = vsel %vm219_vm12, %v226_v46, %v228_v13  ;;  %v230_v22 = vsel %vm218_vm10, %v761_v60, %v211_v0  ;;  %v231_v25 = vsel %vm221_vm13, %v217_v9, 1326507024 }
  0x32   :  { %vm127_vm14 = vc.u32 %v776_v12, %v771_v5  ;;  %v259_v26 = vand.u32 65535, %v229_v21  ;;  %v260_v27 = vshrl.u32 %v229_v21, 16  ;;  %v232_v28 = vsel %vm220_vm11, %v214_v7, %v231_v25 }
  0x33   :  { %v128_v23 = vadd.s32 1, %v124_v62  ;;  %v233_v11 = vsel %vm219_vm12, %v230_v22, %v232_v28  ;;  %v202_v54 = vshrl.u32 %v681_v38, %v734_v6  ;;  %v223_v57 = vsel %vm221_vm13, %v211_v0, 2102212464 }
  0x34   :  { %v262_v29 = vmul.u32 %v260_v27, %v235_v15  ;;  %v237_v31 = vand.u32 65535, %v233_v11  ;;  %v238_v32 = vshrl.u32 %v233_v11, 16  ;;  %v261_v34 = vmul.u32 %v259_v26, %v235_v15 }
  0x35   :  { %v129_v33 = vsel %vm127_vm14, %v128_v23, %v124_v62  ;;  %v263_v35 = vmul.u32 %v259_v26, %v236_v16  ;;  %v264_v42 = vmul.u32 %v260_v27, %v236_v16  ;;  %v222_v0 = vsel %vm218_vm10, %v202_v54, %v752_v51 }
  0x36   :  { %v130_v30 = vadd.s32 %v129_v33, %v125_v20  ;;  %v265_v36 = vshll.u32 %v262_v29, 16  ;;  %v239_v39 = vmul.u32 %v237_v31, %v235_v15  ;;  %v240_v41 = vmul.u32 %v238_v32, %v235_v15 }
  0x37   :  { %v241_v43 = vmul.u32 %v237_v31, %v236_v16  ;;  %v267_v45 = vshll.u32 %v263_v35, 16  ;;  %v242_v49 = vmul.u32 %v238_v32, %v236_v16  ;;  %v266_v3 = vshrl.u32 %v262_v29, 16 }
  0x38   :  { %v131_v37 = vadd.s32 536870912, %v130_v30  ;;  %v243_v40 = vshll.u32 %v240_v41, 16  ;;  %vm269_vm15 = vc.u32 %v261_v34, %v265_v36  ;;  %v271_v53 = vadd.s32 %v265_v36, %v261_v34 }
  0x39   :  { %v245_v50 = vshll.u32 %v241_v43, 16  ;;  %v270_v59 = vsel %vm269_vm15, 1, %v687_v52  ;;  %v244_v63 = vshrl.u32 %v240_v41, 16  ;;  %v246_v4 = vshrl.u32 %v241_v43, 16 }
  0x3a   :  { %v803_v47 = vshrl.u32 %v131_v37, 30  ;;  %vm247_vm0 = vc.u32 %v239_v39, %v243_v40  ;;  %v249_v56 = vadd.s32 %v243_v40, %v239_v39  ;;  %vm273_vm1 = vc.u32 %v271_v53, %v267_v45 }
  0x3b   :  { %v248_v58 = vsel %vm247_vm0, 1, %v687_v52  ;;  %v272_v44 = vadd.s32 %v270_v59, %v264_v42  ;;  %v274_v38 = vsel %vm273_vm1, 1, %v687_v52  ;;  %v224_v8 = vsel %vm220_vm11, %v761_v60, %v223_v57 }
  0x3c   :  { %v133_v48 = vshll.u32 %v803_v47, 30  ;;  %v250_v1 = vadd.s32 %v248_v58, %v242_v49  ;;  %vm251_vm2 = vc.u32 %v249_v56, %v245_v50  ;;  %v268_v9 = vshrl.u32 %v263_v35, 16 }
  0x3d   :  { %v252_v2 = vsel %vm251_vm2, 1, %v687_v52  ;;  %v276_v46 = vadd.s32 %v274_v38, %v272_v44  ;;  %v275_v15 = vadd.s32 %v271_v53, %v267_v45  ;;  %v225_v52 = vsel %vm219_vm12, %v222_v0, %v224_v8 }
  0x3e   :  { %v134_v61 = vsub.s32 %v130_v30, %v133_v48  ;;  %v254_v7 = vadd.s32 %v252_v2, %v250_v1  ;;  %v126_v51 = vadd.s32 %v771_v5, %v776_v12  ;;  %v279_v23 = vmul.u32 %v737_v10, %v225_v52 }
  0x3f   :  { %v277_v16 = vadd.s32 %v276_v46, %v266_v3  ;;  %vm34_vm6 = vcmp.lt.s32.totalorder %v709_v17, 0  ;;  %v156_v39 = vsub.s32 4, %v803_v47  ;;  %vm33_vm7 = vcmp.le.f32.partialorder %v32_v19, 0.7853982 }
  0x40   :  { %vm135_vm3 = vcmp.lt.s32.totalorder %v134_v61, 0  ;;  %v136_v6 = vsub.s32 0, %v134_v61  ;;  %v255_v62 = vadd.s32 %v254_v7, %v244_v63  ;;  %vm188_vm13 = vcmp.lt.s32.totalorder %v711_v18, 0 }
  0x41   :  { %v278_v22 = vadd.s32 %v277_v16, %v268_v9  ;;  %v157_v40 = vsel %vm34_vm6, %v156_v39, %v803_v47  ;;  %vm175_vm1 = vweird.f32 %v709_v17  ;;  %vm839_vm2 = vcmp.le.f32.partialorder %v186_v24, 0.7853982 }
  0x42   :  { %v137_v55 = vsel %vm135_vm3, %v136_v6, %v134_v61  ;;  %v256_v20 = vadd.s32 %v255_v62, %v246_v4  ;;  %v159_v54 = vsel %vm33_vm7, 0, %v157_v40 }
  0x43   :  { %v138_v13 = vclz %v137_v55  ;;  %v282_v60 = vadd.s32 1, %v278_v22  ;;  %v486_v3 = vadd.s32 3, %v159_v54  ;;  %v176_v0 = vand.u32 3, %v159_v54 }
  0x44   :  { %vm281_vm5 = vc.u32 %v256_v20, %v275_v15  ;;  %v280_v58 = vadd.s32 %v275_v15, %v256_v20 }
  0x45   :  { %v663_v21 = vadd.s32 4294967294, %v138_v13  ;;  %v283_v33 = vsel %vm281_vm5, %v282_v60, %v278_v22  ;;  %v487_v46 = vand.u32 3, %v486_v3  ;;  %vm181_vm10 = vcmp.eq.s32.totalorder %v176_v0, 2 }
  0x46   :  { %v284_v14 = vadd.s32 %v283_v33, %v279_v23  ;;  %vm177_vm12 = vcmp.lt.s32.totalorder %v176_v0, 2  ;;  %vm178_vm14 = vcmp.eq.s32.totalorder %v176_v0, 0 }
  0x47   :  { %vm664_vm4 = vcmp.lt.s32.totalorder %v663_v21, 0  ;;  %vm492_vm11 = vcmp.eq.s32.totalorder %v487_v46, 2  ;;  %vm489_vm15 = vcmp.eq.s32.totalorder %v487_v46, 0  ;;  %vm488_vm0 = vcmp.lt.s32.totalorder %v487_v46, 2 }
  0x48   :  { %v141_v25 = vsel %vm664_vm4, 0, %v663_v21  ;;  %v285_v32 = vadd.s32 536870912, %v284_v14 }
  0x49   :  { %v142_v26 = vsub.s32 32, %v141_v25  ;;  %v143_v27 = vshll.u32 %v134_v61, %v141_v25  ;;  %v146_v28 = vsub.s32 4294967266, %v141_v25 }
  0x4a   :  { %v825_v36 = vshrl.u32 %v285_v32, 30 }
  0x4b   :  { %v144_v11 = vshrl.u32 %v126_v51, %v142_v26  ;;  %v147_v29 = vadd.s32 127, %v146_v28 }
  0x4c   :  { %v287_v10 = vshll.u32 %v825_v36, 30  ;;  %v310_v23 = vsub.s32 4, %v825_v36 }
  0x4d   :  { %v145_v30 = vor.u32 %v144_v11, %v143_v27  ;;  %v148_v31 = vshll.u32 %v147_v29, 23 }
  0x4e   :  { %v288_v37 = vsub.s32 %v284_v14, %v287_v10 }
  0x4f   :  { %v149_v34 = vor.u32 4788187, %v148_v31  ;;  %v152_v35 = vcvt.s32.f32 %v145_v30 }
  0x50   :  { %vm289_vm8 = vcmp.lt.s32.totalorder %v288_v37, 0  ;;  %v290_v43 = vsub.s32 0, %v288_v37 }
  0x51   :  { %v150_v5 = vand.u32 2147483647, %v149_v34 }
  0x52   :  { %v291_v49 = vsel %vm289_vm8, %v290_v43, %v288_v37 }
  0x53   :  { %v153_v12 = vmul.f32 %v152_v35, %v150_v5  ;;  %v292_v42 = vclz %v291_v49 }
  0x55   :  { %v154_v41 = vxor.u32 2147483648, %v153_v12  ;;  %v666_v48 = vadd.s32 4294967294, %v292_v42 }
  0x57   :  { %v155_v45 = vsel %vm34_vm6, %v154_v41, %v153_v12  ;;  %vm667_vm9 = vcmp.lt.s32.totalorder %v666_v48, 0 }
  0x58   :  { %v158_v50 = vsel %vm33_vm7, %v709_v17, %v155_v45  ;;  %v295_v19 = vsel %vm667_vm9, 0, %v666_v48  ;;  %v311_v17 = vsel %vm188_vm13, %v310_v23, %v825_v36  ;;  %vm329_vm9 = vweird.f32 %v711_v18 }
  0x59   :  { %v160_v53 = vmul.f32 %v158_v50, %v158_v50  ;;  %v296_v63 = vsub.s32 32, %v295_v19  ;;  %v297_v1 = vshll.u32 %v288_v37, %v295_v19  ;;  %v300_v2 = vsub.s32 4294967266, %v295_v19 }
  0x5a   :  { %v313_v35 = vsel %vm839_vm2, 0, %v311_v17 }
  0x5b   :  { %v161_v56 = vmul.f32 -0.001358992, %v160_v53  ;;  %v168_v57 = vmul.f32 -0.00019511016, %v160_v53  ;;  %v298_v47 = vshrl.u32 %v280_v58, %v296_v63  ;;  %v301_v6 = vadd.s32 127, %v300_v2 }
  0x5c   :  { %v641_v37 = vadd.s32 3, %v313_v35  ;;  %v330_v49 = vand.u32 3, %v313_v35 }
  0x5d   :  { %v162_v59 = vadd.f32 0.041655596, %v161_v56  ;;  %v169_v61 = vadd.f32 0.008332121, %v168_v57  ;;  %v299_v8 = vor.u32 %v298_v47, %v297_v1  ;;  %v302_v9 = vshll.u32 %v301_v6, 23 }
  0x5e   :  { %v642_v40 = vand.u32 3, %v641_v37  ;;  %vm335_vm3 = vcmp.eq.s32.totalorder %v330_v49, 2  ;;  %vm331_vm5 = vcmp.lt.s32.totalorder %v330_v49, 2  ;;  %vm332_vm6 = vcmp.eq.s32.totalorder %v330_v49, 0 }
  0x5f   :  { %v163_v44 = vmul.f32 %v162_v59, %v160_v53  ;;  %v170_v38 = vmul.f32 %v169_v61, %v160_v53  ;;  %v303_v13 = vor.u32 4788187, %v302_v9  ;;  %v306_v15 = vcvt.s32.f32 %v299_v8 }
  0x60   :  { %vm647_vm4 = vcmp.eq.s32.totalorder %v642_v40, 2  ;;  %vm644_vm7 = vcmp.eq.s32.totalorder %v642_v40, 0  ;;  %vm643_vm8 = vcmp.lt.s32.totalorder %v642_v40, 2 }
  0x61   :  { %v164_v4 = vadd.f32 -0.4999988, %v163_v44  ;;  %v171_v7 = vadd.f32 -0.16666654, %v170_v38  ;;  %v304_v20 = vand.u32 2147483647, %v303_v13 }
  0x63   :  { %v165_v55 = vmul.f32 %v164_v4, %v160_v53  ;;  %v172_v62 = vmul.f32 %v171_v7, %v160_v53  ;;  %v307_v51 = vmul.f32 %v306_v15, %v304_v20 }
  0x65   :  { %v166_v16 = vadd.f32 1.0, %v165_v55  ;;  %v173_v52 = vadd.f32 1.0, %v172_v62  ;;  %v308_v28 = vxor.u32 2147483648, %v307_v51 }
  0x67   :  { %v174_v21 = vmul.f32 %v173_v52, %v158_v50  ;;  %v182_v22 = vxor.u32 2147483648, %v166_v16  ;;  %v309_v14 = vsel %vm188_vm13, %v308_v28, %v307_v51 }
  0x68   :  { %v312_v24 = vsel %vm839_vm2, %v711_v18, %v309_v14 }
  0x69   :  { %v179_v60 = vxor.u32 2147483648, %v174_v21  ;;  %v183_v25 = vsel %vm181_vm10, %v182_v22, %v174_v21  ;;  %v494_v26 = vsel %vm492_vm11, %v182_v22, %v174_v21  ;;  %v314_v34 = vmul.f32 %v312_v24, %v312_v24 }
  0x6b   :  { %v180_v33 = vsel %vm178_vm14, %v166_v16, %v179_v60  ;;  %v491_v11 = vsel %vm489_vm15, %v166_v16, %v179_v60  ;;  %v315_v5 = vmul.f32 -0.001358992, %v314_v34  ;;  %v322_v10 = vmul.f32 -0.00019511016, %v314_v34 }
  0x6c   :  { %v184_v29 = vsel %vm177_vm12, %v180_v33, %v183_v25  ;;  %v495_v30 = vsel %vm488_vm0, %v491_v11, %v494_v26 }
  0x6d   :  { %v185_v31 = vsel %vm175_vm1, nan, %v184_v29  ;;  %v496_v32 = vsel %vm175_vm1, nan, %v495_v30  ;;  %v316_v36 = vadd.f32 0.041655596, %v315_v5  ;;  %v323_v12 = vadd.f32 0.008332121, %v322_v10 }
  0x6e   :  { %340 = vst [vmem:[%s868_s1] sm:$0xff] %v185_v31 }
  0x6f   :  { %652 = vst [vmem:[%s869_s2] sm:$0xff] %v496_v32  ;;  %v317_v39 = vmul.f32 %v316_v36, %v314_v34  ;;  %v324_v41 = vmul.f32 %v323_v12, %v314_v34 }
  0x71   :  { %v318_v43 = vadd.f32 -0.4999988, %v317_v39  ;;  %v325_v45 = vadd.f32 -0.16666654, %v324_v41 }
  0x73   :  { %v319_v50 = vmul.f32 %v318_v43, %v314_v34  ;;  %v326_v42 = vmul.f32 %v325_v45, %v314_v34 }
  0x75   :  { %v320_v53 = vadd.f32 1.0, %v319_v50  ;;  %v327_v48 = vadd.f32 1.0, %v326_v42 }
  0x77   :  { %v328_v54 = vmul.f32 %v327_v48, %v312_v24  ;;  %v336_v56 = vxor.u32 2147483648, %v320_v53 }
  0x79   :  { %v333_v57 = vxor.u32 2147483648, %v328_v54  ;;  %v337_v58 = vsel %vm335_vm3, %v336_v56, %v328_v54  ;;  %v649_v59 = vsel %vm647_vm4, %v336_v56, %v328_v54 }
  0x7b   :  { %v334_v61 = vsel %vm332_vm6, %v320_v53, %v333_v57  ;;  %v646_v19 = vsel %vm644_vm7, %v320_v53, %v333_v57 }
  0x7c   :  { %v338_v63 = vsel %vm331_vm5, %v334_v61, %v337_v58  ;;  %v650_v1 = vsel %vm643_vm8, %v646_v19, %v649_v59 }
  0x7d   :  { %v339_v2 = vsel %vm329_vm9, nan, %v338_v63  ;;  %v651_v3 = vsel %vm329_vm9, nan, %v650_v1 }
  0x7e   :  { %341 = vst [vmem:[%s868_s1 + $0x8] sm:$0xff] %v339_v2 }
  0x7f   :  { %653 = vst [vmem:[%s869_s2 + $0x8] sm:$0xff] %v651_v3 }

</bundles_post_ra>
